<compile_context>
chip_gen: v6e
topology: v6e:2x2x1
jax: 0.10.0
libtpu: 0.0.40
codegen_flags: <defaults>
</compile_context>

<pallas_src>
import functools
import math

import jax
import jax.numpy as jnp
from jax import lax
from jax.experimental import pallas as pl
from jax.experimental.pallas import tpu as pltpu


def _dice_partial_kernel(pred_ref, targ_ref, inter_ref, denom_ref, *, m, tile_n):
    """Accumulate per-row sum(p*t) and sum(p+t) across the feature-tile axis."""
    k = pl.program_id(1)
    n_k = pl.num_programs(1)

    @pl.when(k == 0)
    def _():
        inter_ref[...] = jnp.zeros_like(inter_ref)
        denom_ref[...] = jnp.zeros_like(denom_ref)

    def accumulate(p, t):
        inter_ref[...] += jnp.sum(p * t, axis=1, keepdims=True)
        denom_ref[...] += jnp.sum(p + t, axis=1, keepdims=True)

    rem = m % tile_n  # static Python int
    if rem == 0:
        accumulate(pred_ref[...].astype(jnp.float32),
                   targ_ref[...].astype(jnp.float32))
    else:
        # Mask-free fast path for every full tile.
        @pl.when(k < n_k - 1)
        def _():
            accumulate(pred_ref[...].astype(jnp.float32),
                       targ_ref[...].astype(jnp.float32))

        # Ragged last tile: lanes past the true feature extent hold undefined
        # DMA'd data -> zero them before any arithmetic touches them.
        @pl.when(k == n_k - 1)
        def _():
            p = pred_ref[...].astype(jnp.float32)
            t = targ_ref[...].astype(jnp.float32)
            keep = lax.broadcasted_iota(jnp.int32, p.shape, 1) < rem
            accumulate(jnp.where(keep, p, 0.0), jnp.where(keep, t, 0.0))


def _sublane_multiple(itemsize):
    # Native sublane tiling: 8 for 4-byte, 16 for 2-byte, 32 for 1-byte dtypes.
    return 8 * max(1, 4 // itemsize)


def _tpu_plan():
    """Generation-specific knobs: (#TensorCores/chip, vmem_limit, input budget)."""
    kind = ""
    try:
        dev = jax.devices()[0]
        if dev.platform == "tpu":
            kind = dev.device_kind.lower()
    except Exception:  # non-TPU / exotic runtimes -> conservative defaults
        pass
    mib = 1024 * 1024
    if "v7" in kind or "7x" in kind:
        # v7x: 2 TCs/chip, 64 MiB VMEM/TC -> 48 MiB scoped limit (headroom),
        # 36 MiB budget for double-buffered inputs + in-kernel f32 temps.
        return 2, 48 * mib, 36 * mib
    if "v6" in kind or "v5" in kind:
        # v5e/v6e: 1 TC/chip, 128 MiB physical VMEM -> roomier budgets keep
        # tile_n at the 32768 cap even for large batches.
        return 1, 64 * mib, 48 * mib
    # Unknown chip: conservative defaults that fit every supported target.
    return 1, 32 * mib, 24 * mib


def _pick_tile_n(rpc, m, p_item, t_item, budget):
    # Per lane column the pipeline holds 2 double-buffered copies of each
    # input plus ~3 full-tile f32 temporaries (casts / product / sum) inside
    # the kernel body, all rpc rows tall.
    bytes_per_col = rpc * (2 * (p_item + t_item) + 3 * 4)
    tile_n = (budget // max(1, bytes_per_col)) // 128 * 128
    tile_n = min(tile_n, ((m + 127) // 128) * 128, 32768)
    return max(tile_n, 128)


@jax.jit
def dice_loss(pred, target):
    """Pallas-TPU equivalent of PyTorch DiceLoss.forward(pred, target)."""
    b = pred.shape[0]
    n = 1
    for d in pred.shape[1:]:
        n *= d

    p_item = jnp.dtype(pred.dtype).itemsize
    t_item = jnp.dtype(target.dtype).itemsize
    sublane_mult = max(_sublane_multiple(p_item), _sublane_multiple(t_item))

    pred_flat = pred.reshape(b, n)
    targ_flat = target.reshape(b, n)

    # Sublane packing: split each batch row into `sub` sub-rows so the sublane
    # axis of every vreg is filled even for tiny batches.  If an exact split
    # cannot fill the sublanes, zero-pad the feature axis once (zeros
    # contribute nothing to either sum).
    sub = math.gcd(n, sublane_mult)
    if b * sub < sublane_mult:
        n_pad = ((n + sublane_mult - 1) // sublane_mult) * sublane_mult
        if n_pad != n:
            pad = ((0, 0), (0, n_pad - n))
            pred_flat = jnp.pad(pred_flat, pad)
            targ_flat = jnp.pad(targ_flat, pad)
            n = n_pad
        sub = sublane_mult

    rows = b * sub
    m = n // sub
    pred2d = pred_flat.reshape(rows, m)
    targ2d = targ_flat.reshape(rows, m)

    n_cores, vmem_limit, budget = _tpu_plan()
    # Only split rows across TensorCores when the per-core block keeps the
    # native sublane tiling aligned (and the chip actually has 2 TCs).
    if rows % (2 * sublane_mult) != 0:
        n_cores = 1
    rpc = rows // n_cores

    tile_n = _pick_tile_n(rpc, m, p_item, t_item, budget)
    num_tiles = pl.cdiv(m, tile_n)

    kernel = functools.partial(_dice_partial_kernel, m=m, tile_n=tile_n)

    inter, denom = pl.pallas_call(
        kernel,
        out_shape=(
            jax.ShapeDtypeStruct((rows, 1), jnp.float32),
            jax.ShapeDtypeStruct((rows, 1), jnp.float32),
        ),
        grid_spec=pltpu.PrefetchScalarGridSpec(
            num_scalar_prefetch=0,
            grid=(n_cores, num_tiles),
            in_specs=(
                pl.BlockSpec((rpc, tile_n), lambda c, k: (c, k)),
                pl.BlockSpec((rpc, tile_n), lambda c, k: (c, k)),
            ),
            out_specs=(
                pl.BlockSpec((rpc, 1), lambda c, k: (c, 0)),
                pl.BlockSpec((rpc, 1), lambda c, k: (c, 0)),
            ),
        ),
        compiler_params=pltpu.CompilerParams(
            dimension_semantics=("parallel", "arbitrary"),
            vmem_limit_bytes=vmem_limit,
        ),
    )(pred2d, targ2d)

    # Combine sub-row partial sums back into per-batch sums (tiny arrays).
    inter_b = jnp.sum(inter.reshape(b, sub), axis=1)
    denom_b = jnp.sum(denom.reshape(b, sub), axis=1)

    smooth = jnp.float32(1.0)
    dice = (2.0 * inter_b + smooth) / (denom_b + smooth)
    return 1.0 - jnp.sum(dice) / jnp.float32(b)


def _reference_dice_loss(pred, target):
    smooth = 1.0
    b = pred.shape[0]
    pred_flat = pred.reshape(b, -1)
    targ_flat = target.reshape(b, -1)
    inter = (pred_flat * targ_flat).sum(1)
    score = (2.0 * inter + smooth) / (pred_flat.sum(1) + targ_flat.sum(1) + smooth)
    return 1.0 - score.sum() / b


if __name__ == "__main__":
    key = jax.random.PRNGKey(0)
    k1, k2 = jax.random.split(key)

    # NCHW, matching the PyTorch module's expected conv-style inputs.
    b, c, h, w = 2, 4, 16, 16
    pred = jax.nn.sigmoid(jax.random.normal(k1, (b, c, h, w), jnp.float32))
    target = (jax.random.uniform(k2, (b, c, h, w)) > 0.5).astype(jnp.float32)

    out = dice_loss(pred, target)
    out = jax.block_until_ready(out)

    ref = _reference_dice_loss(pred, target)
    assert jnp.allclose(out, ref, atol=1e-5, rtol=1e-5), (out, ref)

    print("KERNEL_OK")
</pallas_src>

<mosaic_0001>
module attributes {stable_mosaic.version = 11 : i64} {
  func.func @_dice_partial_kernel(%arg0: i32, %arg1: i32, %arg2: memref<16x128xf32, #tpu.memory_space<vmem>>, %arg3: memref<16x128xf32, #tpu.memory_space<vmem>>, %arg4: memref<16x1xf32, #tpu.memory_space<vmem>>, %arg5: memref<16x1xf32, #tpu.memory_space<vmem>>) attributes {dimension_semantics = [#tpu.dimension_semantics<parallel>, #tpu.dimension_semantics<arbitrary>], iteration_bounds = array<i64: 1, 1>, scalar_prefetch = 0 : i64, scratch_operands = 0 : i64, tpu.core_type = #tpu.core_type<tc>, window_params = [{transform_indices = @transform_0, window_bounds = array<i64: 16, 128>}, {transform_indices = @transform_1, window_bounds = array<i64: 16, 128>}, {transform_indices = @transform_2, window_bounds = array<i64: 16, 1>}, {transform_indices = @transform_3, window_bounds = array<i64: 16, 1>}]} {
    %c0_i32 = arith.constant 0 : i32
    %0 = arith.cmpi eq, %arg1, %c0_i32 : i32
    %1 = arith.extui %0 : i1 to i32
    %c0_i32_0 = arith.constant 0 : i32
    %2 = arith.cmpi ne, %1, %c0_i32_0 : i32
    scf.if %2 {
      %cst_13 = arith.constant 0.000000e+00 : f32
      %17 = vector.broadcast %cst_13 : f32 to vector<16x1xf32>
      %c0_14 = arith.constant 0 : index
      %c0_15 = arith.constant 0 : index
      %18 = vector.load %arg4[%c0_14, %c0_15] : memref<16x1xf32, #tpu.memory_space<vmem>>, vector<16x1xf32>
      tpu.vector_store %arg4[%c0_14, %c0_15], %17 {strides = array<i32>} : memref<16x1xf32, #tpu.memory_space<vmem>>, vector<16x1xf32>,
      %cst_16 = arith.constant 0.000000e+00 : f32
      %19 = vector.broadcast %cst_16 : f32 to vector<16x1xf32>
      %c0_17 = arith.constant 0 : index
      %c0_18 = arith.constant 0 : index
      %20 = vector.load %arg5[%c0_17, %c0_18] : memref<16x1xf32, #tpu.memory_space<vmem>>, vector<16x1xf32>
      tpu.vector_store %arg5[%c0_17, %c0_18], %19 {strides = array<i32>} : memref<16x1xf32, #tpu.memory_space<vmem>>, vector<16x1xf32>,
    } else {
    }
    %c0 = arith.constant 0 : index
    %c0_1 = arith.constant 0 : index
    %3 = vector.load %arg2[%c0, %c0_1] : memref<16x128xf32, #tpu.memory_space<vmem>>, vector<16x128xf32>
    %c0_2 = arith.constant 0 : index
    %c0_3 = arith.constant 0 : index
    %4 = vector.load %arg3[%c0_2, %c0_3] : memref<16x128xf32, #tpu.memory_space<vmem>>, vector<16x128xf32>
    %c0_4 = arith.constant 0 : index
    %c0_5 = arith.constant 0 : index
    %5 = vector.load %arg4[%c0_4, %c0_5] : memref<16x1xf32, #tpu.memory_space<vmem>>, vector<16x1xf32>
    %6 = arith.mulf %3, %4 : vector<16x128xf32>
    %cst = arith.constant dense<0.000000e+00> : vector<16xf32>
    %7 = vector.multi_reduction <add>, %6, %cst [1] : vector<16x128xf32> to vector<16xf32>
    %8 = vector.shape_cast %7 : vector<16xf32> to vector<16x1xf32>
    %9 = arith.addf %5, %8 : vector<16x1xf32>
    %c0_6 = arith.constant 0 : index
    %c0_7 = arith.constant 0 : index
    %10 = vector.load %arg4[%c0_6, %c0_7] : memref<16x1xf32, #tpu.memory_space<vmem>>, vector<16x1xf32>
    tpu.vector_store %arg4[%c0_6, %c0_7], %9 {strides = array<i32>} : memref<16x1xf32, #tpu.memory_space<vmem>>, vector<16x1xf32>,
    %c0_8 = arith.constant 0 : index
    %c0_9 = arith.constant 0 : index
    %11 = vector.load %arg5[%c0_8, %c0_9] : memref<16x1xf32, #tpu.memory_space<vmem>>, vector<16x1xf32>
    %12 = arith.addf %3, %4 : vector<16x128xf32>
    %cst_10 = arith.constant dense<0.000000e+00> : vector<16xf32>
    %13 = vector.multi_reduction <add>, %12, %cst_10 [1] : vector<16x128xf32> to vector<16xf32>
    %14 = vector.shape_cast %13 : vector<16xf32> to vector<16x1xf32>
    %15 = arith.addf %11, %14 : vector<16x1xf32>
    %c0_11 = arith.constant 0 : index
    %c0_12 = arith.constant 0 : index
    %16 = vector.load %arg5[%c0_11, %c0_12] : memref<16x1xf32, #tpu.memory_space<vmem>>, vector<16x1xf32>
    tpu.vector_store %arg5[%c0_11, %c0_12], %15 {strides = array<i32>} : memref<16x1xf32, #tpu.memory_space<vmem>>, vector<16x1xf32>,
    return
  }
  func.func @transform_0(%arg0: i32, %arg1: i32) -> (i32, i32) {
    %c0_i32 = arith.constant 0 : i32
    return %arg0, %arg1 : i32, i32
  }
  func.func @transform_1(%arg0: i32, %arg1: i32) -> (i32, i32) {
    %c0_i32 = arith.constant 0 : i32
    return %arg0, %arg1 : i32, i32
  }
  func.func @transform_2(%arg0: i32, %arg1: i32) -> (i32, i32) {
    %c0_i32 = arith.constant 0 : i32
    %c0_i32_0 = arith.constant 0 : i32
    return %arg0, %c0_i32 : i32, i32
  }
  func.func @transform_3(%arg0: i32, %arg1: i32) -> (i32, i32) {
    %c0_i32 = arith.constant 0 : i32
    %c0_i32_0 = arith.constant 0 : i32
    return %arg0, %c0_i32 : i32, i32
  }
}

</mosaic_0001>

<bundles_post_ra>
// kernel: dice_loss.1
= control target key start
LH: loop header
LB: loop body
LE: loop exit
PB: predicated region body
PF: predicated region fallthrough
CT: control target
= control target key end

     0   :  { %vm17_vm0 = vcmask 7168   ;;  %v60_v3 = vmov 0.0   ;;  %s137_s0 = inlined_call_operand.vmem [shape: f32[16,128], index: 0, kind: input, shape index: {}]   ;;  %s138_s1 = inlined_call_operand.vmem [shape: f32[16,128], index: 1, kind: input, shape index: {}]   ;;  %s139_s3 = inlined_call_operand.vmem [shape: f32[16,1], index: 3, kind: output, shape index: {1}]   ;;  %s140_s2 = inlined_call_operand.vmem [shape: f32[16,1], index: 2, kind: output, shape index: {0}]  }
   0x1   :  { %v22_v0 = vld [vmem:[%s137_s0] sm:$0xff]  ;;  %v23_v2 = vld [vmem:[%s137_s0 + $0x8] sm:$0xff]  ;;  %20 = vst.msk [vmem:[%s139_s3] sm:$0xff] %vm17_vm0, %v60_v3  ;;  %21 = vst.msk [vmem:[%s139_s3 + $0x8] sm:$0xff] %vm17_vm0, %v60_v3 }
   0x2   :  { %v24_v1 = vld [vmem:[%s138_s1] sm:$0xff]  ;;  %v25_v6 = vld [vmem:[%s138_s1 + $0x8] sm:$0xff]  ;;  %18 = vst.msk [vmem:[%s140_s2] sm:$0xff] %vm17_vm0, %v60_v3  ;;  %19 = vst.msk [vmem:[%s140_s2 + $0x8] sm:$0xff] %vm17_vm0, %v60_v3 }
   0x3   :  { %v41_v4 = vadd.f32 %v24_v1, %v22_v0  ;;  %v28_v5 = vmul.f32 %v24_v1, %v22_v0  ;;  %v42_v7 = vadd.f32 %v25_v6, %v23_v2  ;;  %v29_v8 = vmul.f32 %v25_v6, %v23_v2 }
   0x5   :  { %43 = vadd.xlane.f32.xlu1 %v41_v4  ;;  %30 = vadd.xlane.f32.xlu0 %v28_v5 }
   0x8   :  { %v39_v9 = vld [vmem:[%s139_s3] sm:$0xff]  ;;  %v40_v15 = vld [vmem:[%s139_s3 + $0x8] sm:$0xff] }
   0x9   :  { %45 = vadd.xlane.f32.xlu1 %v42_v7  ;;  %32 = vadd.xlane.f32.xlu0 %v29_v8  ;;  %v26_v10 = vld [vmem:[%s140_s2] sm:$0xff]  ;;  %v27_v16 = vld [vmem:[%s140_s2 + $0x8] sm:$0xff] }
  0x8e   :  { %v44_v11 = vpop.xlane.xlu1 %43  ;;  %v31_v12 = vpop.xlane.xlu0 %30 }
  0x8f   :  { %v47_v13 = vadd.f32 %v44_v11, %v39_v9  ;;  %v34_v14 = vadd.f32 %v31_v12, %v26_v10 }
  0x91   :  { %49 = vst.msk [vmem:[%s139_s3] sm:$0xff] %vm17_vm0, %v47_v13  ;;  %37 = vst.msk [vmem:[%s140_s2] sm:$0xff] %vm17_vm0, %v34_v14 }
  0x92   :  { %v46_v17 = vpop.xlane.xlu1 %45  ;;  %v33_v18 = vpop.xlane.xlu0 %32 }
  0x93   :  { %v48_v19 = vadd.f32 %v46_v17, %v40_v15  ;;  %v35_v20 = vadd.f32 %v33_v18, %v27_v16 }
  0x95   :  { %50 = vst.msk [vmem:[%s139_s3 + $0x8] sm:$0xff] %vm17_vm0, %v48_v19  ;;  %38 = vst.msk [vmem:[%s140_s2 + $0x8] sm:$0xff] %vm17_vm0, %v35_v20 }

</bundles_post_ra>
